<compile_context>
chip_gen: v6e
topology: v6e:2x2x1
jax: 0.10.0
libtpu: 0.0.40
codegen_flags: <defaults>
</compile_context>

<pallas_src>
import functools

import jax
import jax.numpy as jnp
from jax import lax
from jax.experimental import pallas as pl
from jax.experimental.pallas import tpu as pltpu


# ----------------------------------------------------------------------------
# VMEM budgeting / tile selection
# ----------------------------------------------------------------------------
def _vmem_budget_bytes():
    try:
        kind = jax.devices()[0].device_kind.lower()
    except Exception:
        kind = ""
    if ("v5" in kind) or ("v6" in kind):
        return 96 * 1024 * 1024      # 128 MiB physical VMEM parts
    return 44 * 1024 * 1024          # v7x (64 MiB physical) / unknown: conservative


def _tile_vmem_bytes(th, Wp, Cin, Cmid, Cout):
    L1, L2, Lp = (th + 2) * Wp, th * Wp, (th + 4) * Wp
    b = 3 * Lp * Cin * 2 + Lp * 3 * Cin * 2            # pooled, dx shifts, pooled3 (bf16)
    b += L1 * Cmid * 4                                  # conv1 f32 accumulator
    b += 3 * L1 * Cmid * 2 + L1 * 3 * Cmid * 2          # h (+shifts) bf16, h3 bf16
    b += L2 * 3 * Cmid * 2                              # conv2 per-dy operand slab (bf16)
    b += L2 * Cout * 4                                  # conv2 f32 accumulator
    b += 2 * L2 * Cout * 4                              # double-buffered f32 output block
    return b


def _pick_tile_h(Hp, Wp, Cin, Cmid, Cout, budget):
    fixed = 2 * (Hp + 4) * 2 * Wp * 2 * Cin * 2         # double-buffered bf16 input block
    fixed += 2 * 2 * 9 * (Cin * Cmid + Cmid * Cout)     # double-buffered bf16 weights
    cands = [d for d in range(1, Hp + 1)
             if Hp % d == 0 and (d == Hp or (d * Wp) % 128 == 0)]
    cands.sort(reverse=True)                            # biggest lane-aligned tile that fits
    for th in cands:
        if fixed + _tile_vmem_bytes(th, Wp, Cin, Cmid, Cout) <= budget:
            return th
    return cands[-1]


# ----------------------------------------------------------------------------
# Pallas kernel:  maxpool(2) -> conv3x3+bias+ReLU (x2)  for one (batch, row-tile)
# ----------------------------------------------------------------------------
def _make_down_kernel(TH, Hp, Wp, Cin, Cmid, Cout):
    R1 = TH + 2            # conv1 output rows per tile (tile + 1 halo row each side)
    RP = TH + 4            # pooled input rows per tile (tile + 2 halo rows each side)
    L1 = R1 * Wp
    L2 = TH * Wp
    f32 = jnp.float32
    bf16 = jnp.bfloat16

    def kernel(x_ref, w1_ref, b1_ref, w2_ref, b2_ref, o_ref):
        ts = pl.program_id(1) * TH                       # first true pooled row of this tile

        # ---- 2x2 max pool on the TH+4 pooled rows this tile needs (bf16, exact) ----
        xb = x_ref[pl.ds(ts, RP)]                        # (RP, 2, Wp, 2*Cin), padded-row window
        rmax = jnp.maximum(xb[:, 0], xb[:, 1])           # max over row parity
        pooled = jnp.maximum(rmax[:, :, :Cin], rmax[:, :, Cin:])   # (RP, Wp, Cin)

        # ---- dx taps built once per conv (zero-filled shifts along w; no wrap masks) ----
        def dx_taps(src, rows, c):
            z = jnp.zeros((rows, 1, c), src.dtype)
            left = jnp.concatenate([z, src[:, :-1, :]], axis=1)    # kw=0: value at w from w-1
            right = jnp.concatenate([src[:, 1:, :], z], axis=1)    # kw=2: value at w from w+1
            return jnp.concatenate([left, src, right], axis=2)     # (rows, Wp, 3*c), (kw, ci) order

        p3 = dx_taps(pooled, RP, Cin)                    # (RP, Wp, 3*Cin)

        # ---- conv1: 3 per-dy matmuls (K = 3*Cin), bf16 MXU, f32 accumulation --------
        acc1 = jnp.zeros((L1, Cmid), f32)
        for g in range(3):                               # g = kh, dy = kh - 1
            op = p3[g:g + R1].reshape(L1, 3 * Cin)
            acc1 = acc1 + jnp.dot(op, w1_ref[g], preferred_element_type=f32)
        h = jnp.maximum(acc1 + b1_ref[...], 0.0).reshape(R1, Wp, Cmid)

        # conv1 rows outside the true image act as ZERO inputs to conv2 (SAME padding
        # applies to conv1's *output*), so zero the phantom halo rows of this tile.
        row = lax.broadcasted_iota(jnp.int32, (R1, 1, 1), 0) + (ts - 1)   # true pooled row id
        h = jnp.where((row >= 0) & (row < Hp), h, 0.0).astype(bf16)

        h3 = dx_taps(h, R1, Cmid)                        # (R1, Wp, 3*Cmid)

        # ---- conv2: 3 per-dy matmuls in NT orientation -> channel-major (Cout, L2) --
        # (contract last dim of both operands: the standard q.k^T MXU fast path)
        acc2 = jnp.zeros((Cout, L2), f32)
        for g in range(3):
            op = h3[g:g + TH].reshape(L2, 3 * Cmid)
            acc2 = acc2 + lax.dot_general(
                w2_ref[g], op, (((1,), (1,)), ((), ())), preferred_element_type=f32)

        # (Cout, TH*Wp) is already an NCHW row-block of the output.
        o_ref[0] = jnp.maximum(acc2 + b2_ref[...], 0.0)

    return kernel


# ----------------------------------------------------------------------------
# Wrapper
# ----------------------------------------------------------------------------
def down_pallas(x_nchw, w1, b1, w2, b2, *, tile_h=None):
    """x_nchw: (N, Cin, H, W) f32.
    w1: (3,3,Cin,Cmid) HWIO with BN scale folded in, b1: (Cmid,) folded shift.
    w2: (3,3,Cmid,Cout), b2: (Cout,).  Returns (N, Cout, H//2, W//2) f32."""
    N, Cin, H, W = x_nchw.shape
    assert H % 2 == 0 and W % 2 == 0, "MaxPool2d(2) requires even H and W"
    Hp, Wp = H // 2, W // 2
    Cmid = w1.shape[-1]
    Cout = w2.shape[-1]

    budget = _vmem_budget_bytes()
    if tile_h is None:
        tile_h = _pick_tile_h(Hp, Wp, Cin, Cmid, Cout, int(0.75 * budget))
    TH = int(tile_h)
    assert Hp % TH == 0, "tile_h must divide the pooled height"
    assert TH == Hp or (TH * Wp) % 128 == 0, "output tile must stay lane-aligned"
    n_tiles = Hp // TH

    # NCHW -> NHWC bf16, expose the 2x2 pool window, zero-pad 2 pooled rows
    # on each side (2-row pooled halo for the fused double conv).
    x = jnp.transpose(x_nchw, (0, 2, 3, 1)).astype(jnp.bfloat16)   # (N, H, W, Cin)
    xr = x.reshape(N, Hp, 2, Wp, 2 * Cin)
    xr = jnp.pad(xr, ((0, 0), (2, 2), (0, 0), (0, 0), (0, 0)))
    xr = xr.reshape(N * (Hp + 4), 2, Wp, 2 * Cin)

    # Weight prep (one time): per-dy (kh) slabs so the kernel slices the leading dim.
    w1p = w1.reshape(3, 3 * Cin, Cmid).astype(jnp.bfloat16)                         # (kh, kw*ci, co)
    w2p = jnp.transpose(w2.reshape(3, 3 * Cmid, Cout), (0, 2, 1)).astype(jnp.bfloat16)  # (kh, co, kw*ci)
    b1p = b1.reshape(1, Cmid).astype(jnp.float32)
    b2p = b2.reshape(Cout, 1).astype(jnp.float32)

    kernel = _make_down_kernel(TH, Hp, Wp, Cin, Cmid, Cout)

    out = pl.pallas_call(
        kernel,
        out_shape=jax.ShapeDtypeStruct((N, Cout, Hp * Wp), jnp.float32),
        grid_spec=pltpu.PrefetchScalarGridSpec(
            num_scalar_prefetch=0,
            grid=(N, n_tiles),
            in_specs=[
                # whole (padded) image of one batch element; block index is constant
                # across the row-tile axis so it is DMA'd once per n and re-used.
                pl.BlockSpec((Hp + 4, 2, Wp, 2 * Cin), lambda n, t: (n, 0, 0, 0)),
                pl.BlockSpec((3, 3 * Cin, Cmid), lambda n, t: (0, 0, 0)),
                pl.BlockSpec((1, Cmid), lambda n, t: (0, 0)),
                pl.BlockSpec((3, Cout, 3 * Cmid), lambda n, t: (0, 0, 0)),
                pl.BlockSpec((Cout, 1), lambda n, t: (0, 0)),
            ],
            out_specs=pl.BlockSpec((1, Cout, TH * Wp), lambda n, t: (n, 0, t)),
        ),
        compiler_params=pltpu.CompilerParams(
            dimension_semantics=("parallel", "parallel"),
            vmem_limit_bytes=budget,
        ),
    )(xr, w1p, b1p, w2p, b2p)

    # channel-major kernel output is already in NCHW order
    return out.reshape(N, Cout, Hp, Wp)


# ----------------------------------------------------------------------------
# Deterministic parameter construction (PyTorch shapes -> folded kernel params)
# ----------------------------------------------------------------------------
def make_params(key, cin, cmid, cout, eps=1e-5):
    keys = jax.random.split(key, 12)

    def conv_bn(ks, ci, co):
        kw, kb, kg, kbeta, km, kv = ks
        w_oihw = 0.1 * jax.random.normal(kw, (co, ci, 3, 3), jnp.float32)
        bias = 0.1 * jax.random.normal(kb, (co,), jnp.float32)
        gamma = 1.0 + 0.1 * jax.random.normal(kg, (co,), jnp.float32)
        beta = 0.1 * jax.random.normal(kbeta, (co,), jnp.float32)
        mean = 0.1 * jax.random.normal(km, (co,), jnp.float32)
        var = jax.nn.softplus(jax.random.normal(kv, (co,), jnp.float32)) + 0.1
        scale = gamma / jnp.sqrt(var + eps)                  # (co,)
        w_hwio = jnp.transpose(w_oihw, (2, 3, 1, 0))         # (3,3,ci,co)
        w_folded = w_hwio * scale[None, None, None, :]       # BN scale -> weights
        b_folded = (bias - mean) * scale + beta              # folded bias/shift
        return w_folded, b_folded

    w1, b1 = conv_bn(keys[0:6], cin, cmid)
    w2, b2 = conv_bn(keys[6:12], cmid, cout)
    return w1, b1, w2, b2


# ----------------------------------------------------------------------------
# Plain-JAX reference (mirrors kernel numerics: bf16 operands, f32 accumulate)
# ----------------------------------------------------------------------------
def down_ref(x_nchw, w1, b1, w2, b2):
    f32 = jnp.float32
    x = jnp.transpose(x_nchw, (0, 2, 3, 1)).astype(jnp.bfloat16).astype(f32)
    pooled = lax.reduce_window(x, -jnp.inf, lax.max,
                               (1, 2, 2, 1), (1, 2, 2, 1), "VALID")
    dn = ("NHWC", "HWIO", "NHWC")
    w1f = w1.astype(jnp.bfloat16).astype(f32)
    w2f = w2.astype(jnp.bfloat16).astype(f32)
    h = lax.conv_general_dilated(pooled, w1f, (1, 1), "SAME",
                                 dimension_numbers=dn,
                                 precision=lax.Precision.HIGHEST)
    h = jnp.maximum(h + b1[None, None, None, :], 0.0)
    h = h.astype(jnp.bfloat16).astype(f32)   # kernel feeds conv2 bf16 activations
    y = lax.conv_general_dilated(h, w2f, (1, 1), "SAME",
                                 dimension_numbers=dn,
                                 precision=lax.Precision.HIGHEST)
    y = jnp.maximum(y + b2[None, None, None, :], 0.0)
    return jnp.transpose(y, (0, 3, 1, 2))


if __name__ == "__main__":
    key = jax.random.PRNGKey(0)
    kx, kp, kx2 = jax.random.split(key, 3)

    N, Cin = 2, 4
    Cout = 8
    Cmid = Cout  # DoubleConv default: mid_channels = out_channels
    params = make_params(kp, Cin, Cmid, Cout)

    # Case 1: small spec shape (single row tile).
    H = W = 16
    x = jax.random.normal(kx, (N, Cin, H, W), jnp.float32)
    out = jax.block_until_ready(jax.jit(down_pallas)(x, *params))
    ref = down_ref(x, *params)
    assert out.shape == (N, Cout, H // 2, W // 2)
    d1 = float(jnp.max(jnp.abs(out - ref)))
    assert jnp.allclose(out, ref, atol=2e-3, rtol=2e-3), (
        "mismatch vs reference (case 1): max |diff| = %e" % d1)

    # Case 2: exercises the row-tiled path (2 tiles, 2-row pooled halo, border masks).
    H2 = W2 = 32
    x2 = jax.random.normal(kx2, (N, Cin, H2, W2), jnp.float32)
    down_tiled = jax.jit(functools.partial(down_pallas, tile_h=8))
    out2 = jax.block_until_ready(down_tiled(x2, *params))
    ref2 = down_ref(x2, *params)
    assert out2.shape == (N, Cout, H2 // 2, W2 // 2)
    d2 = float(jnp.max(jnp.abs(out2 - ref2)))
    assert jnp.allclose(out2, ref2, atol=2e-3, rtol=2e-3), (
        "mismatch vs reference (case 2, tiled): max |diff| = %e" % d2)

    print("KERNEL_OK")
</pallas_src>

<mosaic_0001>
module attributes {stable_mosaic.version = 11 : i64} {
  func.func @kernel(%arg0: i32, %arg1: i32, %arg2: memref<12x2x8x8xbf16, #tpu.memory_space<vmem>>, %arg3: memref<3x12x8xbf16, #tpu.memory_space<vmem>>, %arg4: memref<1x8xf32, #tpu.memory_space<vmem>>, %arg5: memref<3x8x24xbf16, #tpu.memory_space<vmem>>, %arg6: memref<8x1xf32, #tpu.memory_space<vmem>>, %arg7: memref<1x8x64xf32, #tpu.memory_space<vmem>>) attributes {dimension_semantics = [#tpu.dimension_semantics<parallel>, #tpu.dimension_semantics<parallel>], iteration_bounds = array<i64: 2, 1>, scalar_prefetch = 0 : i64, scratch_operands = 0 : i64, tpu.core_type = #tpu.core_type<tc>, window_params = [{transform_indices = @transform_0, window_bounds = array<i64: 12, 2, 8, 8>}, {pipeline_mode = #tpu.pipeline_mode<synchronous>, transform_indices = @transform_1, window_bounds = array<i64: 3, 12, 8>}, {pipeline_mode = #tpu.pipeline_mode<synchronous>, transform_indices = @transform_2, window_bounds = array<i64: 1, 8>}, {pipeline_mode = #tpu.pipeline_mode<synchronous>, transform_indices = @transform_3, window_bounds = array<i64: 3, 8, 24>}, {pipeline_mode = #tpu.pipeline_mode<synchronous>, transform_indices = @transform_4, window_bounds = array<i64: 8, 1>}, {transform_indices = @transform_5, window_bounds = array<i64: 1, 8, 64>}]} {
    %c8_i32 = arith.constant 8 : i32
    %0 = arith.muli %arg1, %c8_i32 : i32
    %1 = arith.index_cast %0 : i32 to index
    %c0 = arith.constant 0 : index
    %c0_0 = arith.constant 0 : index
    %c0_1 = arith.constant 0 : index
    %2 = vector.load %arg2[%1, %c0, %c0_0, %c0_1] : memref<12x2x8x8xbf16, #tpu.memory_space<vmem>>, vector<12x2x8x8xbf16>
    %3 = vector.extract_strided_slice %2 {offsets = [0, 0, 0, 0], sizes = [12, 1, 8, 8], strides = [1, 1, 1, 1]} : vector<12x2x8x8xbf16> to vector<12x1x8x8xbf16>
    %4 = vector.shape_cast %3 : vector<12x1x8x8xbf16> to vector<12x8x8xbf16>
    %5 = vector.extract_strided_slice %2 {offsets = [0, 1, 0, 0], sizes = [12, 1, 8, 8], strides = [1, 1, 1, 1]} : vector<12x2x8x8xbf16> to vector<12x1x8x8xbf16>
    %6 = vector.shape_cast %5 : vector<12x1x8x8xbf16> to vector<12x8x8xbf16>
    %7 = arith.maximumf %4, %6 : vector<12x8x8xbf16>
    %8 = vector.extract_strided_slice %7 {offsets = [0, 0, 0], sizes = [12, 8, 4], strides = [1, 1, 1]} : vector<12x8x8xbf16> to vector<12x8x4xbf16>
    %9 = vector.extract_strided_slice %7 {offsets = [0, 0, 4], sizes = [12, 8, 4], strides = [1, 1, 1]} : vector<12x8x8xbf16> to vector<12x8x4xbf16>
    %10 = arith.maximumf %8, %9 : vector<12x8x4xbf16>
    %cst = arith.constant 0.000000e+00 : bf16
    %11 = vector.broadcast %cst : bf16 to vector<12x1x4xbf16>
    %12 = vector.extract_strided_slice %10 {offsets = [0, 0, 0], sizes = [12, 7, 4], strides = [1, 1, 1]} : vector<12x8x4xbf16> to vector<12x7x4xbf16>
    %13 = tpu.concatenate %11, %12 in 1 : vector<12x1x4xbf16>, vector<12x7x4xbf16> -> vector<12x8x4xbf16>
    %14 = vector.extract_strided_slice %10 {offsets = [0, 1, 0], sizes = [12, 7, 4], strides = [1, 1, 1]} : vector<12x8x4xbf16> to vector<12x7x4xbf16>
    %15 = tpu.concatenate %14, %11 in 1 : vector<12x7x4xbf16>, vector<12x1x4xbf16> -> vector<12x8x4xbf16>
    %16 = tpu.concatenate %13, %10, %15 in 2 : vector<12x8x4xbf16>, vector<12x8x4xbf16>, vector<12x8x4xbf16> -> vector<12x8x12xbf16>
    %cst_2 = arith.constant 0.000000e+00 : f32
    %17 = vector.broadcast %cst_2 : f32 to vector<80x8xf32>
    %18 = vector.extract_strided_slice %16 {offsets = [0, 0, 0], sizes = [10, 8, 12], strides = [1, 1, 1]} : vector<12x8x12xbf16> to vector<10x8x12xbf16>
    %19 = vector.shape_cast %18 : vector<10x8x12xbf16> to vector<80x12xbf16>
    %c0_3 = arith.constant 0 : index
    %c0_4 = arith.constant 0 : index
    %c0_5 = arith.constant 0 : index
    %20 = vector.load %arg3[%c0_3, %c0_4, %c0_5] : memref<3x12x8xbf16, #tpu.memory_space<vmem>>, vector<1x12x8xbf16>
    %21 = vector.shape_cast %20 : vector<1x12x8xbf16> to vector<12x8xbf16>
    %cst_6 = arith.constant dense<0.000000e+00> : vector<80x8xf32>
    %22 = tpu.matmul %19, %21, %cst_6 {dimension_numbers = #tpu.dot_dimension_numbers<[1], [0], [0], [1], [0, 0, 1, 1], [], []>} : vector<80x12xbf16>, vector<12x8xbf16>, vector<80x8xf32> -> vector<80x8xf32>
    %23 = arith.addf %17, %22 : vector<80x8xf32>
    %24 = vector.extract_strided_slice %16 {offsets = [1, 0, 0], sizes = [10, 8, 12], strides = [1, 1, 1]} : vector<12x8x12xbf16> to vector<10x8x12xbf16>
    %25 = vector.shape_cast %24 : vector<10x8x12xbf16> to vector<80x12xbf16>
    %c1 = arith.constant 1 : index
    %c0_7 = arith.constant 0 : index
    %c0_8 = arith.constant 0 : index
    %26 = vector.load %arg3[%c1, %c0_7, %c0_8] : memref<3x12x8xbf16, #tpu.memory_space<vmem>>, vector<1x12x8xbf16>
    %27 = vector.shape_cast %26 : vector<1x12x8xbf16> to vector<12x8xbf16>
    %cst_9 = arith.constant dense<0.000000e+00> : vector<80x8xf32>
    %28 = tpu.matmul %25, %27, %cst_9 {dimension_numbers = #tpu.dot_dimension_numbers<[1], [0], [0], [1], [0, 0, 1, 1], [], []>} : vector<80x12xbf16>, vector<12x8xbf16>, vector<80x8xf32> -> vector<80x8xf32>
    %29 = arith.addf %23, %28 : vector<80x8xf32>
    %30 = vector.extract_strided_slice %16 {offsets = [2, 0, 0], sizes = [10, 8, 12], strides = [1, 1, 1]} : vector<12x8x12xbf16> to vector<10x8x12xbf16>
    %31 = vector.shape_cast %30 : vector<10x8x12xbf16> to vector<80x12xbf16>
    %c2 = arith.constant 2 : index
    %c0_10 = arith.constant 0 : index
    %c0_11 = arith.constant 0 : index
    %32 = vector.load %arg3[%c2, %c0_10, %c0_11] : memref<3x12x8xbf16, #tpu.memory_space<vmem>>, vector<1x12x8xbf16>
    %33 = vector.shape_cast %32 : vector<1x12x8xbf16> to vector<12x8xbf16>
    %cst_12 = arith.constant dense<0.000000e+00> : vector<80x8xf32>
    %34 = tpu.matmul %31, %33, %cst_12 {dimension_numbers = #tpu.dot_dimension_numbers<[1], [0], [0], [1], [0, 0, 1, 1], [], []>} : vector<80x12xbf16>, vector<12x8xbf16>, vector<80x8xf32> -> vector<80x8xf32>
    %35 = arith.addf %29, %34 : vector<80x8xf32>
    %c0_13 = arith.constant 0 : index
    %c0_14 = arith.constant 0 : index
    %36 = vector.load %arg4[%c0_13, %c0_14] : memref<1x8xf32, #tpu.memory_space<vmem>>, vector<1x8xf32>
    %37 = vector.broadcast %36 : vector<1x8xf32> to vector<80x8xf32>
    %38 = arith.addf %35, %37 : vector<80x8xf32>
    %cst_15 = arith.constant 0.000000e+00 : f32
    %39 = vector.broadcast %cst_15 : f32 to vector<80x8xf32>
    %40 = arith.maximumf %38, %39 : vector<80x8xf32>
    %41 = vector.shape_cast %40 : vector<80x8xf32> to vector<10x8x8xf32>
    %42 = tpu.iota {dimensions = array<i32: 0>} : vector<10x1x1xi32>
    %c1_i32 = arith.constant 1 : i32
    %43 = arith.subi %0, %c1_i32 : i32
    %44 = vector.broadcast %43 : i32 to vector<10x1x1xi32>
    %45 = arith.addi %42, %44 : vector<10x1x1xi32>
    %c0_i32 = arith.constant 0 : i32
    %46 = vector.broadcast %c0_i32 : i32 to vector<10x1x1xi32>
    %47 = arith.cmpi sge, %45, %46 : vector<10x1x1xi32>
    %c8_i32_16 = arith.constant 8 : i32
    %48 = vector.broadcast %c8_i32_16 : i32 to vector<10x1x1xi32>
    %49 = arith.cmpi slt, %45, %48 : vector<10x1x1xi32>
    %50 = arith.andi %47, %49 : vector<10x1x1xi1>
    %cst_17 = arith.constant 0.000000e+00 : f32
    %51 = vector.shape_cast %50 : vector<10x1x1xi1> to vector<10x1x1xi1>
    %52 = vector.broadcast %51 : vector<10x1x1xi1> to vector<10x8x8xi1>
    %53 = vector.broadcast %cst_17 : f32 to vector<10x8x8xf32>
    %54 = arith.select %52, %41, %53 : vector<10x8x8xi1>, vector<10x8x8xf32>
    %55 = arith.truncf %54 : vector<10x8x8xf32> to vector<10x8x8xbf16>
    %cst_18 = arith.constant 0.000000e+00 : bf16
    %56 = vector.broadcast %cst_18 : bf16 to vector<10x1x8xbf16>
    %57 = vector.extract_strided_slice %55 {offsets = [0, 0, 0], sizes = [10, 7, 8], strides = [1, 1, 1]} : vector<10x8x8xbf16> to vector<10x7x8xbf16>
    %58 = tpu.concatenate %56, %57 in 1 : vector<10x1x8xbf16>, vector<10x7x8xbf16> -> vector<10x8x8xbf16>
    %59 = vector.extract_strided_slice %55 {offsets = [0, 1, 0], sizes = [10, 7, 8], strides = [1, 1, 1]} : vector<10x8x8xbf16> to vector<10x7x8xbf16>
    %60 = tpu.concatenate %59, %56 in 1 : vector<10x7x8xbf16>, vector<10x1x8xbf16> -> vector<10x8x8xbf16>
    %61 = tpu.concatenate %58, %55, %60 in 2 : vector<10x8x8xbf16>, vector<10x8x8xbf16>, vector<10x8x8xbf16> -> vector<10x8x24xbf16>
    %cst_19 = arith.constant 0.000000e+00 : f32
    %62 = vector.broadcast %cst_19 : f32 to vector<8x64xf32>
    %63 = vector.extract_strided_slice %61 {offsets = [0, 0, 0], sizes = [8, 8, 24], strides = [1, 1, 1]} : vector<10x8x24xbf16> to vector<8x8x24xbf16>
    %64 = vector.shape_cast %63 : vector<8x8x24xbf16> to vector<64x24xbf16>
    %c0_20 = arith.constant 0 : index
    %c0_21 = arith.constant 0 : index
    %c0_22 = arith.constant 0 : index
    %65 = vector.load %arg5[%c0_20, %c0_21, %c0_22] : memref<3x8x24xbf16, #tpu.memory_space<vmem>>, vector<1x8x24xbf16>
    %66 = vector.shape_cast %65 : vector<1x8x24xbf16> to vector<8x24xbf16>
    %cst_23 = arith.constant dense<0.000000e+00> : vector<8x64xf32>
    %67 = tpu.matmul %66, %64, %cst_23 {dimension_numbers = #tpu.dot_dimension_numbers<[1], [1], [0], [0], [0, 0, 1, 0], [], []>} : vector<8x24xbf16>, vector<64x24xbf16>, vector<8x64xf32> -> vector<8x64xf32>
    %68 = arith.addf %62, %67 : vector<8x64xf32>
    %69 = vector.extract_strided_slice %61 {offsets = [1, 0, 0], sizes = [8, 8, 24], strides = [1, 1, 1]} : vector<10x8x24xbf16> to vector<8x8x24xbf16>
    %70 = vector.shape_cast %69 : vector<8x8x24xbf16> to vector<64x24xbf16>
    %c1_24 = arith.constant 1 : index
    %c0_25 = arith.constant 0 : index
    %c0_26 = arith.constant 0 : index
    %71 = vector.load %arg5[%c1_24, %c0_25, %c0_26] : memref<3x8x24xbf16, #tpu.memory_space<vmem>>, vector<1x8x24xbf16>
    %72 = vector.shape_cast %71 : vector<1x8x24xbf16> to vector<8x24xbf16>
    %cst_27 = arith.constant dense<0.000000e+00> : vector<8x64xf32>
    %73 = tpu.matmul %72, %70, %cst_27 {dimension_numbers = #tpu.dot_dimension_numbers<[1], [1], [0], [0], [0, 0, 1, 0], [], []>} : vector<8x24xbf16>, vector<64x24xbf16>, vector<8x64xf32> -> vector<8x64xf32>
    %74 = arith.addf %68, %73 : vector<8x64xf32>
    %75 = vector.extract_strided_slice %61 {offsets = [2, 0, 0], sizes = [8, 8, 24], strides = [1, 1, 1]} : vector<10x8x24xbf16> to vector<8x8x24xbf16>
    %76 = vector.shape_cast %75 : vector<8x8x24xbf16> to vector<64x24xbf16>
    %c2_28 = arith.constant 2 : index
    %c0_29 = arith.constant 0 : index
    %c0_30 = arith.constant 0 : index
    %77 = vector.load %arg5[%c2_28, %c0_29, %c0_30] : memref<3x8x24xbf16, #tpu.memory_space<vmem>>, vector<1x8x24xbf16>
    %78 = vector.shape_cast %77 : vector<1x8x24xbf16> to vector<8x24xbf16>
    %cst_31 = arith.constant dense<0.000000e+00> : vector<8x64xf32>
    %79 = tpu.matmul %78, %76, %cst_31 {dimension_numbers = #tpu.dot_dimension_numbers<[1], [1], [0], [0], [0, 0, 1, 0], [], []>} : vector<8x24xbf16>, vector<64x24xbf16>, vector<8x64xf32> -> vector<8x64xf32>
    %80 = arith.addf %74, %79 : vector<8x64xf32>
    %c0_32 = arith.constant 0 : index
    %c0_33 = arith.constant 0 : index
    %81 = vector.load %arg6[%c0_32, %c0_33] : memref<8x1xf32, #tpu.memory_space<vmem>>, vector<8x1xf32>
    %82 = vector.broadcast %81 : vector<8x1xf32> to vector<8x64xf32>
    %83 = arith.addf %80, %82 : vector<8x64xf32>
    %cst_34 = arith.constant 0.000000e+00 : f32
    %84 = vector.broadcast %cst_34 : f32 to vector<8x64xf32>
    %85 = arith.maximumf %83, %84 : vector<8x64xf32>
    %c0_35 = arith.constant 0 : index
    %c0_36 = arith.constant 0 : index
    %c0_37 = arith.constant 0 : index
    %86 = vector.load %arg7[%c0_35, %c0_36, %c0_37] : memref<1x8x64xf32, #tpu.memory_space<vmem>>, vector<1x8x64xf32>
    %87 = vector.shape_cast %86 : vector<1x8x64xf32> to vector<8x64xf32>
    %88 = vector.shape_cast %85 : vector<8x64xf32> to vector<1x8x64xf32>
    tpu.vector_store %arg7[%c0_35, %c0_36, %c0_37], %88 {strides = array<i32>} : memref<1x8x64xf32, #tpu.memory_space<vmem>>, vector<1x8x64xf32>,
    return
  }
  func.func @transform_0(%arg0: i32, %arg1: i32) -> (i32, i32, i32, i32) {
    %c0_i32 = arith.constant 0 : i32
    %c0_i32_0 = arith.constant 0 : i32
    %c0_i32_1 = arith.constant 0 : i32
    %c0_i32_2 = arith.constant 0 : i32
    return %arg0, %c0_i32, %c0_i32_0, %c0_i32_1 : i32, i32, i32, i32
  }
  func.func @transform_1(%arg0: i32, %arg1: i32) -> (i32, i32, i32) {
    %c0_i32 = arith.constant 0 : i32
    %c0_i32_0 = arith.constant 0 : i32
    %c0_i32_1 = arith.constant 0 : i32
    %c0_i32_2 = arith.constant 0 : i32
    return %c0_i32, %c0_i32_0, %c0_i32_1 : i32, i32, i32
  }
  func.func @transform_2(%arg0: i32, %arg1: i32) -> (i32, i32) {
    %c0_i32 = arith.constant 0 : i32
    %c0_i32_0 = arith.constant 0 : i32
    %c0_i32_1 = arith.constant 0 : i32
    return %c0_i32, %c0_i32_0 : i32, i32
  }
  func.func @transform_3(%arg0: i32, %arg1: i32) -> (i32, i32, i32) {
    %c0_i32 = arith.constant 0 : i32
    %c0_i32_0 = arith.constant 0 : i32
    %c0_i32_1 = arith.constant 0 : i32
    %c0_i32_2 = arith.constant 0 : i32
    return %c0_i32, %c0_i32_0, %c0_i32_1 : i32, i32, i32
  }
  func.func @transform_4(%arg0: i32, %arg1: i32) -> (i32, i32) {
    %c0_i32 = arith.constant 0 : i32
    %c0_i32_0 = arith.constant 0 : i32
    %c0_i32_1 = arith.constant 0 : i32
    return %c0_i32, %c0_i32_0 : i32, i32
  }
  func.func @transform_5(%arg0: i32, %arg1: i32) -> (i32, i32, i32) {
    %c0_i32 = arith.constant 0 : i32
    %c0_i32_0 = arith.constant 0 : i32
    return %arg0, %c0_i32, %arg1 : i32, i32, i32
  }
}

</mosaic_0001>

<bundles_post_ra>
// kernel: down_pallas.1
= control target key start
LH: loop header
LB: loop body
LE: loop exit
PB: predicated region body
PF: predicated region fallthrough
CT: control target
= control target key end

     0   :  { %s1928_s18 = smov 0   ;;  %s1930_s19 = smov 0   ;;  %s2520_s0 = inlined_call_operand.vmem [shape: bf16[24,2,8,8], index: 0, kind: input, shape index: {}]   ;;  %s2521_s1 = inlined_call_operand.vmem [shape: bf16[3,12,8], index: 1, kind: input, shape index: {}]   ;;  %s2522_s2 = inlined_call_operand.vmem [shape: f32[1,8], index: 2, kind: input, shape index: {}]   ;;  %s2523_s3 = inlined_call_operand.vmem [shape: bf16[3,8,24], index: 3, kind: input, shape index: {}]   ;;  %s2524_s4 = inlined_call_operand.vmem [shape: f32[8,1], index: 4, kind: input, shape index: {}]   ;;  %s2525_s5 = inlined_call_operand.vmem [shape: f32[2,8,64], index: 5, kind: output, shape index: {}]  }
   0x1   :  { %s1932_s20 = smov 0  }
   0x2 LB: > { %s27_s21 = sadd.s32 1, %s1884_s19  ;;  %p1628_p0 = scmp.ge.s32.totalorder %s1888_s20, 1  ;;  %s1888_s20 = sphi %s1932_s20, %s15_s20   ;;  %s1884_s19 = sphi %s1930_s19, %s2531_s19   ;;  %s1880_s18 = sphi %s1928_s18, %s2530_s18  }
   0x3   : > { %p29_p1 = scmp.ge.s32.totalorder %s27_s21, 2  ;;  %p203_p2 = scmp.lt.s32.totalorder %s1888_s20, 3 }
   0x5   : > { %s2533_s21 = smov (%p29_p1, %s27_s21), 0  ;;  %p204_p3 = pnand %p1628_p0, %p203_p2 }
   0x6   : > { %s234_s22 = smul.u32 (!%p204_p3), 12, %s1880_s18  ;;  %s1890_s27 = smov (!%p204_p3), 124  }
   0x7   : > { %207 = sbr.rel (%p204_p3) target bundleno = 930 (0x3a2), region = 40  ;;  %s1892_s30 = smov (!%p204_p3), 4  }
   0x8   : > { %p235_p4 = scmp.lt.s32.totalorder (!%p204_p3), %s234_s22, 23  ;;  %s1894_s6 = smov (!%p204_p3), 8  }
   0x9   : > { %s1896_s13 = smov (!%p204_p3), 16   ;;  %p241_p5 = scmp.lt.s32.totalorder (!%p204_p3), %s1880_s18, 1 }
   0xc   : > { %s2535_s22 = smov (!%p235_p4, %s234_s22), 23  ;;  %v1891_v37 = vmov 0.0   ;;  %v1863_v43 = vld [vmem:[%s2521_s1 + $0x8] sm:$0x3f]   ;;  %vm720_vm0 = vcmask 1045504   ;;  %vm532_vm1 = vcmask 1043456  }
   0xd   : > { %s1694_s23 = sshll.u32 %s2535_s22, 3  ;;  %1728 = vmatprep.subr.bf16.mxu0 %v1891_v37  ;;  %1750 = vmatprep.subr.bf16.mxu1 %v1891_v37  ;;  %vm533_vm2 = vsmask.f32 3328  ;;  %vm1893_vm3 = vmmov 0   ;;  %v722_v48 = vsel %vm720_vm0, %v1863_v43, 0  ;;  %vm481_vm5 = vcmask 1040384  }
   0xe   : > { %s1952_s26 = scalar_lea.vmem %s2520_s0, %s1694_s23  ;;  %1730 = vmatprep.mubr.msk.bf16.mxu0 %vm1893_vm3, %v1891_v37  ;;  %1752 = vmatprep.mubr.msk.bf16.mxu1 %vm1893_vm3, %v1891_v37  ;;  %vm2038_vm4 = vmand %vm532_vm1, %vm533_vm2  ;;  %vm482_vm6 = vsmask.f32 256  ;;  %vm607_vm8 = vcmask 31744   ;;  %vm644_vm9 = vcmask 64512   ;;  %vm704_vm10 = vcmask 97280   ;;  %s2537_s18 = smov (!%p241_p5, %s1880_s18), 1 }
   0xf   : > { %v255_v0 = vld [vmem:[%s1952_s26 + $0x8] sm:$0xf]  ;;  %v256_v1 = vld [vmem:[%s1952_s26 + $0xc] sm:$0xf]  ;;  %v259_v2 = vld [vmem:[%s1952_s26 + $0x18] sm:$0xf]  ;;  %1729 = vmatpush3.bf16.msra.mxu0 %v722_v48 }
  0x10   : > { %v278_v3 = vmax.bf16 %v256_v1, %v255_v0  ;;  %v260_v4 = vld [vmem:[%s1952_s26 + $0x1c] sm:$0xf]  ;;  %v257_v5 = vld [vmem:[%s1952_s26 + $0x10] sm:$0xf]  ;;  %v258_v6 = vld [vmem:[%s1952_s26 + $0x14] sm:$0xf]  ;;  %1772 = vmatprep.subr.bf16.mxu0 %v1891_v37 }
  0x11   : > { %v280_v7 = vmax.bf16 %v260_v4, %v259_v2  ;;  %v261_v8 = vld [vmem:[%s1952_s26 + $0x20] sm:$0xf]  ;;  %v262_v9 = vld [vmem:[%s1952_s26 + $0x24] sm:$0xf]  ;;  %v279_v10 = vmax.bf16 %v258_v6, %v257_v5  ;;  %v263_v12 = vld [vmem:[%s1952_s26 + $0x28] sm:$0xf] }
  0x12   : > { %303 = vrot.lane.b32.xlu0 %v278_v3, %s1890_s27  ;;  %v281_v11 = vmax.bf16 %v262_v9, %v261_v8  ;;  %v264_v13 = vld [vmem:[%s1952_s26 + $0x2c] sm:$0xf]  ;;  %v265_v14 = vld [vmem:[%s1952_s26 + $0x30] sm:$0xf]  ;;  %v266_v15 = vld [vmem:[%s1952_s26 + $0x34] sm:$0xf] }
  0x13   : > { %307 = vrot.lane.b32.xlu1 %v280_v7, %s1890_s27  ;;  %v1969_v16 = vmax.bf16 %v264_v13, %v263_v12  ;;  %v1972_v17 = vmax.bf16 %v266_v15, %v265_v14  ;;  %v267_v18 = vld [vmem:[%s1952_s26 + $0x38] sm:$0xf]  ;;  %v268_v19 = vld [vmem:[%s1952_s26 + $0x3c] sm:$0xf]  ;;  %v269_v20 = vld [vmem:[%s1952_s26 + $0x40] sm:$0xf] }
  0x14   : > { %v270_v21 = vld [vmem:[%s1952_s26 + $0x44] sm:$0xf]  ;;  %v1980_v22 = vmax.bf16 %v268_v19, %v267_v18  ;;  %v271_v24 = vld [vmem:[%s1952_s26 + $0x48] sm:$0xf]  ;;  %v272_v25 = vld [vmem:[%s1952_s26 + $0x4c] sm:$0xf] }
  0x15   : > { %v1984_v23 = vmax.bf16 %v270_v21, %v269_v20  ;;  %v273_v26 = vld [vmem:[%s1952_s26 + $0x50] sm:$0xf]  ;;  %v274_v27 = vld [vmem:[%s1952_s26 + $0x54] sm:$0xf]  ;;  %v1992_v28 = vmax.bf16 %v272_v25, %v271_v24  ;;  %v253_v30 = vld [vmem:[%s1952_s26] sm:$0xf] }
  0x16   : > { %305 = vrot.lane.b32.xlu0 %v279_v10, %s1890_s27  ;;  %v1996_v29 = vmax.bf16 %v274_v27, %v273_v26  ;;  %v254_v31 = vld [vmem:[%s1952_s26 + $0x4] sm:$0xf]  ;;  %v275_v32 = vld [vmem:[%s1952_s26 + $0x58] sm:$0xf]  ;;  %v276_v33 = vld [vmem:[%s1952_s26 + $0x5c] sm:$0xf] }
  0x17   : > { %309 = vrot.lane.b32.xlu1 %v281_v11, %s1890_s27  ;;  %v2004_v34 = vmax.bf16 %v254_v31, %v253_v30  ;;  %v2008_v35 = vmax.bf16 %v276_v33, %v275_v32  ;;  %vm2184_vm7 = vmand %vm481_vm5, %vm482_vm6  ;;  %vm1328_vm11 = vcmask 130048   ;;  %vm1372_vm12 = vcmask 195584   ;;  %s1631_s26 = sshll.u32 %s2537_s18, 3 }
  0x18   : > { %s247_s29 = scalar_lea.vmem %s2525_s5, %s1631_s26  ;;  %vm1549_vm13 = vcmask 523264  }
  0x1a   : > { %311 = vrot.lane.b32.xlu0 %v1969_v16, %s1890_s27 }
  0x1b   : > { %313 = vrot.lane.b32.xlu1 %v1972_v17, %s1890_s27 }
  0x1e   : > { %315 = vrot.lane.b32.xlu0 %v1980_v22, %s1890_s27 }
  0x1f   : > { %317 = vrot.lane.b32.xlu1 %v1984_v23, %s1890_s27 }
  0x22   : > { %319 = vrot.lane.b32.xlu0 %v1992_v28, %s1890_s27 }
  0x23   : > { %321 = vrot.lane.b32.xlu1 %v1996_v29, %s1890_s27 }
  0x26   : > { %301 = vrot.lane.b32.xlu0 %v2004_v34, %s1890_s27 }
  0x27   : > { %323 = vrot.lane.b32.xlu1 %v2008_v35, %s1890_s27 }
  0x84   : > { %v304_v36 = vpop.permute.xlu0 %303 }
  0x85   : > { %v338_v38 = vmax.bf16 %v304_v36, %v278_v3  ;;  %v308_v39 = vpop.permute.xlu1 %307 }
  0x86   : > { %v340_v41 = vmax.bf16 %v308_v39, %v280_v7 }
  0x87   : > { %v2016_v40 = vcombine.low %v338_v38, %v338_v38 }
  0x88   : > { %v306_v42 = vpop.permute.xlu0 %305  ;;  %v2030_v50 = vcombine.low %v340_v41, %v340_v41 }
  0x89   : > { %v396_v44 = vshll.u32 %v2016_v40, 16  ;;  %v339_v45 = vmax.bf16 %v306_v42, %v279_v10  ;;  %549 = vrot.lane.b32.xlu1 %v2016_v40, %s1892_s30  ;;  %v310_v46 = vpop.permute.xlu1 %309  ;;  %v393_v49 = vshrl.u32 %v2016_v40, 16 }
  0x8a   : > { %v341_v47 = vmax.bf16 %v310_v46, %v281_v11  ;;  %v410_v63 = vshll.u32 %v2030_v50, 16  ;;  %v407_v15 = vshrl.u32 %v2030_v50, 16 }
  0x8b   : > { %v2032_v51 = vcombine.low %v339_v45, %v339_v45  ;;  %v498_v52 = vrot.slane %v396_v44, 1  ;;  %v395_v27 = vrot.slane %v393_v49, 7 }
  0x8c   : > { %v2036_v53 = vcombine.low %v341_v47, %v341_v47  ;;  %v312_v55 = vpop.permute.xlu0 %311  ;;  %v502_v13 = vrot.slane %v410_v63, 1  ;;  %v409_v30 = vrot.slane %v407_v15, 7 }
  0x8d   : > { %v403_v56 = vshll.u32 %v2032_v51, 16  ;;  %551 = vrot.lane.b32.xlu0 %v2032_v51, %s1892_s30  ;;  %v499_v57 = vor.u32 %v498_v52, %v393_v49  ;;  %v314_v58 = vpop.permute.xlu1 %313  ;;  %v342_v62 = vmax.bf16 %v312_v55, %v1969_v16  ;;  %v400_v0 = vshrl.u32 %v2032_v51, 16 }
  0x8e   : > { %v414_v59 = vshrl.u32 %v2036_v53, 16  ;;  %v417_v60 = vshll.u32 %v2036_v53, 16  ;;  %v343_v61 = vmax.bf16 %v314_v58, %v1972_v17  ;;  %v503_v25 = vor.u32 %v502_v13, %v407_v15 }
  0x8f   : > { %v536_v1 = vsel %vm2038_vm4, %v499_v57, 0  ;;  %v500_v2 = vrot.slane %v403_v56, 1  ;;  %v2062_v9 = vcombine.low %v342_v62, %v342_v62 }
  0x90   : > { %585 = vrot.lane.b32.xlu1 %v536_v1, %s1894_s6  ;;  %v2057_v3 = vcombine.low %v343_v61, %v343_v61  ;;  %v504_v4 = vrot.slane %v417_v60, 1  ;;  %v316_v5 = vpop.permute.xlu0 %315  ;;  %v416_v46 = vrot.slane %v414_v59, 7  ;;  %v538_v47 = vsel %vm2038_vm4, %v503_v25, 0 }
  0x91   : > { %v501_v6 = vor.u32 %v500_v2, %v400_v0  ;;  %v318_v7 = vpop.permute.xlu1 %317  ;;  %v344_v14 = vmax.bf16 %v316_v5, %v1980_v22  ;;  %v421_v36 = vshrl.u32 %v2062_v9, 16  ;;  %v2110_v61 = vor.u32 %v396_v44, %v395_v27 }
  0x92   : > { %v431_v8 = vshll.u32 %v2057_v3, 16  ;;  %v505_v10 = vor.u32 %v504_v4, %v414_v59  ;;  %v345_v11 = vmax.bf16 %v318_v7, %v1984_v23  ;;  %v428_v18 = vshrl.u32 %v2057_v3, 16 }
  0x93   : > { %v537_v12 = vsel %vm2038_vm4, %v501_v6, 0  ;;  %v424_v23 = vshll.u32 %v2062_v9, 16  ;;  %v2084_v26 = vcombine.low %v344_v14, %v344_v14  ;;  %v423_v62 = vrot.slane %v421_v36, 7 }
  0x94   : > { %555 = vrot.lane.b32.xlu1 %v2036_v53, %s1892_s30  ;;  %587 = vrot.lane.b32.xlu0 %v537_v12, %s1894_s6  ;;  %v2074_v16 = vcombine.low %v345_v11, %v345_v11  ;;  %v320_v17 = vpop.permute.xlu0 %319  ;;  %v539_v19 = vsel %vm2038_vm4, %v505_v10, 0  ;;  %v508_v20 = vrot.slane %v431_v8, 1  ;;  %v430_v52 = vrot.slane %v428_v18, 7 }
  0x95   : > { %v322_v21 = vpop.permute.xlu1 %321  ;;  %v346_v22 = vmax.bf16 %v320_v17, %v1992_v28  ;;  %v402_v28 = vrot.slane %v400_v0, 7  ;;  %v506_v43 = vrot.slane %v424_v23, 1  ;;  %v435_v48 = vshrl.u32 %v2084_v26, 16 }
  0x96   : > { %v347_v24 = vmax.bf16 %v322_v21, %v1996_v29  ;;  %v445_v31 = vshll.u32 %v2074_v16, 16  ;;  %v509_v38 = vor.u32 %v508_v20, %v428_v18  ;;  %v442_v41 = vshrl.u32 %v2074_v16, 16 }
  0x97   : > { %v2090_v32 = vcombine.low %v346_v22, %v346_v22  ;;  %v507_v1 = vor.u32 %v506_v43, %v421_v36  ;;  %v2114_v2 = vor.u32 %v403_v56, %v402_v28  ;;  %v437_v4 = vrot.slane %v435_v48, 7 }
  0x98   : > { %591 = vrot.lane.b32.xlu1 %v539_v19, %s1894_s6  ;;  %553 = vrot.lane.b32.xlu0 %v2030_v50, %s1892_s30  ;;  %v302_v33 = vpop.permute.xlu0 %301  ;;  %v1642_v42 = vcombine.low %v347_v24, %v347_v24  ;;  %v512_v57 = vrot.slane %v445_v31, 1  ;;  %v444_v0 = vrot.slane %v442_v41, 7  ;;  %v438_v5 = vshll.u32 %v2084_v26, 16 }
  0x99   : > { %v337_v29 = vmax.bf16 %v302_v33, %v2004_v34  ;;  %v324_v39 = vpop.permute.xlu1 %323  ;;  %v449_v55 = vshrl.u32 %v2090_v32, 16  ;;  %v2122_v51 = vor.u32 %v417_v60, %v416_v46  ;;  %v2126_v56 = vor.u32 %v410_v63, %v409_v30  ;;  %v1865_v33 = vld [vmem:[%s2521_s1] sm:$0x3f]  }
  0x9a   : > { %v348_v45 = vmax.bf16 %v324_v39, %v2008_v35  ;;  %v456_v34 = vshrl.u32 %v1642_v42, 16  ;;  %v541_v35 = vsel %vm2038_vm4, %v509_v38, 0  ;;  %v459_v6 = vshll.u32 %v1642_v42, 16 }
  0x9b   : > { %v2099_v49 = vcombine.low %v337_v29, %v337_v29  ;;  %v451_v44 = vrot.slane %v449_v55, 7  ;;  %v513_v10 = vor.u32 %v512_v57, %v442_v41  ;;  %v2130_v13 = vor.u32 %v431_v8, %v430_v52 }
  0x9c   : > { %559 = vrot.lane.b32.xlu1 %v2057_v3, %s1892_s30  ;;  %589 = vrot.lane.b32.xlu0 %v538_v47, %s1894_s6  ;;  %v1643_v59 = vcombine.low %v348_v45, %v348_v45  ;;  %v458_v40 = vrot.slane %v456_v34, 7  ;;  %v2134_v14 = vor.u32 %v424_v23, %v423_v62  ;;  %v2136_v15 = vor.u32 %v445_v31, %v444_v0  ;;  %v1864_v45 = vld [vmem:[%s2521_s1 + $0x10] sm:$0x3f]  }
  0x9d   : > { %v386_v58 = vshrl.u32 %v2099_v49, 16  ;;  %v452_v17 = vshll.u32 %v2090_v32, 16  ;;  %v510_v53 = vrot.slane %v438_v5, 1  ;;  %v389_v60 = vshll.u32 %v2099_v49, 16 }
  0x9e   : > { %v463_v7 = vshrl.u32 %v1643_v59, 16  ;;  %v466_v18 = vshll.u32 %v1643_v59, 16  ;;  %v543_v50 = vsel %vm2038_vm4, %v513_v10, 0  ;;  %v516_v63 = vrot.slane %v459_v6, 1 }
  0x9f   : > { %v388_v11 = vrot.slane %v386_v58, 7  ;;  %v2145_v3 = vor.u32 %v438_v5, %v437_v4  ;;  %v2147_v8 = vor.u32 %v459_v6, %v458_v40  ;;  %v2149_v19 = vor.u32 %v452_v17, %v451_v44 }
  0xa0   : > { %595 = vrot.lane.b32.xlu1 %v541_v35, %s1894_s6  ;;  %557 = vrot.lane.b32.xlu0 %v2062_v9, %s1892_s30  ;;  %v465_v12 = vrot.slane %v463_v7, 7  ;;  %v540_v9 = vsel %vm2038_vm4, %v507_v1, 0  ;;  %v511_v22 = vor.u32 %v510_v53, %v435_v48  ;;  %v496_v23 = vrot.slane %v389_v60, 1 }
  0xa1   : > { %v2151_v20 = vor.u32 %v389_v60, %v388_v11  ;;  %v514_v25 = vrot.slane %v452_v17, 1  ;;  %v518_v31 = vrot.slane %v466_v18, 1  ;;  %v825_v28 = vsel %vm720_vm0, %v1865_v33, 0 }
  0xa2   : > { %v2153_v21 = vor.u32 %v466_v18, %v465_v12  ;;  %v542_v24 = vsel %vm2038_vm4, %v511_v22, 0  ;;  %v497_v30 = vor.u32 %v496_v23, %v386_v58  ;;  %1751 = vmatpush3.bf16.msra.mxu1 %v825_v28  ;;  %v485_v46 = vsel %vm2184_vm7, 0, %v2110_v61 }
  0xa3   : > { %v519_v38 = vor.u32 %v518_v31, %v463_v7  ;;  %1794 = vmatprep.subr.bf16.mxu1 %v1891_v37  ;;  %v486_v47 = vsel %vm2184_vm7, 0, %v2114_v2  ;;  %v915_v58 = vsel %vm720_vm0, %v1864_v45, 0  ;;  %v488_v62 = vsel %vm2184_vm7, 0, %v2122_v51 }
  0xa4   : > { %563 = vrot.lane.b32.xlu1 %v2074_v16, %s1892_s30  ;;  %593 = vrot.lane.b32.xlu0 %v540_v9, %s1894_s6  ;;  %v517_v16 = vor.u32 %v516_v63, %v456_v34  ;;  %v535_v36 = vsel %vm2038_vm4, %v497_v30, 0  ;;  %v487_v0 = vsel %vm2184_vm7, 0, %v2126_v56  ;;  %v490_v12 = vsel %vm2184_vm7, 0, %v2130_v13 }
  0xa5   : > { %v546_v39 = vsel %vm2038_vm4, %v519_v38, 0  ;;  %v489_v51 = vsel %vm2184_vm7, 0, %v2134_v14  ;;  %v492_v14 = vsel %vm2184_vm7, 0, %v2136_v15 }
  0xa6   : > { %v545_v27 = vsel %vm2038_vm4, %v517_v16, 0  ;;  %v491_v16 = vsel %vm2184_vm7, 0, %v2145_v3  ;;  %v494_v3 = vsel %vm2184_vm7, 0, %v2147_v8  ;;  %v484_v8 = vsel %vm2184_vm7, 0, %v2151_v20 }
  0xa8   : > { %599 = vrot.lane.b32.xlu1 %v543_v50, %s1894_s6  ;;  %561 = vrot.lane.b32.xlu0 %v2084_v26, %s1892_s30  ;;  %v515_v26 = vor.u32 %v514_v25, %v449_v55 }
  0xaa   : > { %v544_v29 = vsel %vm2038_vm4, %v515_v26, 0 }
  0xac   : > { %567 = vrot.lane.b32.xlu1 %v1642_v42, %s1892_s30  ;;  %597 = vrot.lane.b32.xlu0 %v542_v24, %s1894_s6 }
  0xb0   : > { %603 = vrot.lane.b32.xlu1 %v545_v27, %s1894_s6  ;;  %565 = vrot.lane.b32.xlu0 %v2090_v32, %s1892_s30 }
  0xb4   : > { %601 = vrot.lane.b32.xlu0 %v544_v29, %s1894_s6  ;;  %583 = vrot.lane.b32.xlu1 %v535_v36, %s1894_s6  ;;  %v493_v36 = vsel %vm2184_vm7, 0, %v2149_v19 }
  0xb8   : > { %547 = vrot.lane.b32.xlu0 %v2099_v49, %s1892_s30  ;;  %605 = vrot.lane.b32.xlu1 %v546_v39, %s1894_s6 }
  0xbc   : > { %569 = vrot.lane.b32.xlu0 %v1643_v59, %s1892_s30 }
  0xfb   : > { %v550_v32 = vpop.permute.xlu1 %549 }
  0xfc   : > { %v613_v48 = vsel %vm607_vm8, %v485_v46, %v550_v32 }
  0xff   : > { %v552_v42 = vpop.permute.xlu0 %551 }
 0x100   : > { %v616_v49 = vsel %vm607_vm8, %v486_v47, %v552_v42 }
 0x102   : > { %v586_v43 = vpop.permute.xlu1 %585 }
 0x103   : > { %v2200_v55 = vsel %vm644_vm9, %v613_v48, %v586_v43 }
 0x106   : > { %v556_v52 = vpop.permute.xlu1 %555  ;;  %v588_v34 = vpop.permute.xlu0 %587 }
 0x107   : > { %v650_v57 = vsel %vm644_vm9, %v616_v49, %v588_v34  ;;  %v622_v1 = vsel %vm607_vm8, %v488_v62, %v556_v52  ;;  %v495_v34 = vsel %vm2184_vm7, 0, %v2153_v21  ;;  %v1895_v21 = vmov 0  }
 0x108   : > { %v1646_v35 = vcombine.low %v2200_v55, %v650_v57  ;;  %1862 = vset.pattern.permute.xlu0 %v1895_v21 }
 0x10a   : > { %v592_v59 = vpop.permute.xlu1 %591  ;;  %1731 = vmatmul.mubr.msk.bf16.vlgmr.msra.gmra.mxu0 %vm704_vm10, %v1646_v35  ;;  %v554_v61 = vpop.permute.xlu0 %553 }
 0x10b   : > { %1734 = vmatprep.mubr.msk.bf16.mxu0 %vm1893_vm3, %v1891_v37  ;;  %1773 = vmatpush3.bf16.msra.mxu0 %v915_v58  ;;  %v619_v2 = vsel %vm607_vm8, %v487_v0, %v554_v61  ;;  %v654_v6 = vsel %vm644_vm9, %v622_v1, %v592_v59 }
 0x10c   : > { %1818 = vmatprep.subr.bf16.mxu0 %v1891_v37 }
 0x10e   : > { %v560_v4 = vpop.permute.xlu1 %559  ;;  %v590_v5 = vpop.permute.xlu0 %589 }
 0x10f   : > { %v652_v7 = vsel %vm644_vm9, %v619_v2, %v590_v5  ;;  %v628_v56 = vsel %vm607_vm8, %v490_v12, %v560_v4 }
 0x110   : > { %v1647_v40 = vcombine.low %v652_v7, %v654_v6  ;;  %v1658_v44 = vcombine.low %v650_v57, %v652_v7 }
 0x112   : > { %v596_v10 = vpop.permute.xlu1 %595  ;;  %1735 = vmatmul.mubr.msk.bf16.gmra.mxu0 %vm704_vm10, %v1647_v40  ;;  %v558_v11 = vpop.permute.xlu0 %557 }
 0x113   : > { %1738 = vmatprep.mubr.msk.bf16.mxu0 %vm1893_vm3, %v1891_v37  ;;  %v625_v9 = vsel %vm607_vm8, %v489_v51, %v558_v11  ;;  %v658_v60 = vsel %vm644_vm9, %v628_v56, %v596_v10 }
 0x116   : > { %v564_v17 = vpop.permute.xlu1 %563  ;;  %v594_v53 = vpop.permute.xlu0 %593 }
 0x117   : > { %v656_v18 = vsel %vm644_vm9, %v625_v9, %v594_v53  ;;  %v634_v23 = vsel %vm607_vm8, %v492_v14, %v564_v17 }
 0x118   : > { %v1648_v50 = vcombine.low %v656_v18, %v658_v60  ;;  %v1659_v63 = vcombine.low %v654_v6, %v656_v18 }
 0x11a   : > { %v600_v22 = vpop.permute.xlu1 %599  ;;  %1739 = vmatmul.mubr.msk.bf16.gmra.mxu0 %vm704_vm10, %v1648_v50  ;;  %v562_v13 = vpop.permute.xlu0 %561 }
 0x11b   : > { %1742 = vmatprep.mubr.msk.bf16.mxu0 %vm1893_vm3, %v1891_v37  ;;  %v631_v24 = vsel %vm607_vm8, %v491_v16, %v562_v13  ;;  %v662_v30 = vsel %vm644_vm9, %v634_v23, %v600_v22  ;;  %v2310_v16 = vld [vmem:[%s2522_s2] ss:$0 sm:$0xff] }
 0x11e   : > { %v568_v25 = vpop.permute.xlu1 %567  ;;  %v598_v27 = vpop.permute.xlu0 %597 }
 0x11f   : > { %v660_v31 = vsel %vm644_vm9, %v631_v24, %v598_v27  ;;  %v640_v38 = vsel %vm607_vm8, %v494_v3, %v568_v25 }
 0x120   : > { %v1649_v33 = vcombine.low %v660_v31, %v662_v30  ;;  %v1660_v26 = vcombine.low %v658_v60, %v660_v31 }
 0x122   : > { %1743 = vmatmul.mubr.msk.bf16.gmra.mxu0 %vm704_vm10, %v1649_v33  ;;  %v566_v28 = vpop.permute.xlu0 %565  ;;  %v604_v15 = vpop.permute.xlu1 %603 }
 0x123   : > { %1746 = vmatprep.mubr.msk.bf16.mxu0 %vm1893_vm3, %v1891_v37  ;;  %v637_v29 = vsel %vm607_vm8, %v493_v36, %v566_v28  ;;  %v666_v32 = vsel %vm644_vm9, %v640_v38, %v604_v15 }
 0x126   : > { %v602_v39 = vpop.permute.xlu0 %601  ;;  %v584_v43 = vpop.permute.xlu1 %583 }
 0x127   : > { %v664_v42 = vsel %vm644_vm9, %v637_v29, %v602_v39 }
 0x128   : > { %v1650_v45 = vcombine.low %v664_v42, %v666_v32  ;;  %v1661_v46 = vcombine.low %v662_v30, %v664_v42 }
 0x12a   : > { %1747 = vmatmul.mubr.msk.bf16.gmra.mxu0 %vm704_vm10, %v1650_v45  ;;  %v548_v47 = vpop.permute.xlu0 %547  ;;  %v606_v52 = vpop.permute.xlu1 %605 }
 0x12b   : > { %v610_v19 = vsel %vm607_vm8, %v484_v8, %v548_v47  ;;  %1774 = vmatprep.mubr.msk.bf16.mxu0 %vm1893_vm3, %v1891_v37 }
 0x12c   : > { %v646_v48 = vsel %vm644_vm9, %v610_v19, %v584_v43 }
 0x12d   : > { %v1657_v49 = vcombine.low %v646_v48, %v2200_v55 }
 0x12e   : > { %v570_v57 = vpop.permute.xlu0 %569 }
 0x12f   : > { %v643_v35 = vsel %vm607_vm8, %v495_v34, %v570_v57  ;;  %1753 = vmatmul.mubr.msk.bf16.vlgmr.msra.gmra.mxu1 %vm704_vm10, %v1657_v49 }
 0x130   : > { %v668_v20 = vsel %vm644_vm9, %v643_v35, %v606_v52  ;;  %1756 = vmatprep.mubr.msk.bf16.mxu1 %vm1893_vm3, %v1891_v37 }
 0x131   : > { %v1670_v58 = vcombine.low %v666_v32, %v668_v20 }
 0x132   : > { %1775 = vmatmul.mubr.msk.bf16.vlgmr.msra.gmra.mxu0 %vm704_vm10, %v1658_v44 }
 0x133   : > { %1778 = vmatprep.mubr.msk.bf16.mxu0 %vm1893_vm3, %v1891_v37 }
 0x137   : > { %1757 = vmatmul.mubr.msk.bf16.gmra.mxu1 %vm704_vm10, %v1658_v44 }
 0x138   : > { %1760 = vmatprep.mubr.msk.bf16.mxu1 %vm1893_vm3, %v1891_v37 }
 0x13a   : > { %1779 = vmatmul.mubr.msk.bf16.gmra.mxu0 %vm704_vm10, %v1659_v63 }
 0x13b   : > { %1782 = vmatprep.mubr.msk.bf16.mxu0 %vm1893_vm3, %v1891_v37 }
 0x13f   : > { %1761 = vmatmul.mubr.msk.bf16.gmra.mxu1 %vm704_vm10, %v1659_v63 }
 0x140   : > { %1764 = vmatprep.mubr.msk.bf16.mxu1 %vm1893_vm3, %v1891_v37 }
 0x142   : > { %1783 = vmatmul.mubr.msk.bf16.gmra.mxu0 %vm704_vm10, %v1660_v26 }
 0x143   : > { %1786 = vmatprep.mubr.msk.bf16.mxu0 %vm1893_vm3, %v1891_v37 }
 0x147   : > { %1765 = vmatmul.mubr.msk.bf16.gmra.mxu1 %vm704_vm10, %v1660_v26 }
 0x148   : > { %1768 = vmatprep.mubr.msk.bf16.mxu1 %vm1893_vm3, %v1891_v37 }
 0x14a   : > { %1787 = vmatmul.mubr.msk.bf16.gmra.mxu0 %vm704_vm10, %v1661_v46 }
 0x14b   : > { %1790 = vmatprep.mubr.msk.bf16.mxu0 %vm1893_vm3, %v1891_v37 }
 0x14f   : > { %1769 = vmatmul.mubr.msk.bf16.gmra.mxu1 %vm704_vm10, %v1661_v46 }
 0x150   : > { %1802 = vmatprep.mubr.msk.bf16.mxu1 %vm1893_vm3, %v1891_v37 }
 0x152   : > { %1791 = vmatmul.mubr.msk.bf16.gmra.mxu0 %vm704_vm10, %v1670_v58 }
 0x153   : > { %1826 = vmatprep.mubr.msk.bf16.mxu0 %vm1893_vm3, %v1891_v37 }
 0x1ca   : > { %v758_v55 = vpop.f32.mrf.mxu0 }
 0x1cc   : > { %v1732_v59 = vpop.f32.mrf.mxu0 }
 0x1ce   : > { %v761_v61 = vpop.f32.mrf.mxu0 }
 0x1d0   : > { %v1733_v62 = vpop.f32.mrf.mxu0 }
 0x1d2   : > { %v766_v0 = vpop.f32.mrf.mxu0 }
 0x1d4   : > { %v1736_v1 = vpop.f32.mrf.mxu0 }
 0x1d6   : > { %v769_v2 = vpop.f32.mrf.mxu0 }
 0x1d8   : > { %v1737_v4 = vpop.f32.mrf.mxu0 }
 0x1da   : > { %v774_v5 = vpop.f32.mrf.mxu0 }
 0x1dc   : > { %v1740_v6 = vpop.f32.mrf.mxu0 }
 0x1de   : > { %v777_v7 = vpop.f32.mrf.mxu0 }
 0x1e0   : > { %v1741_v40 = vpop.f32.mrf.mxu0 }
 0x1e2   : > { %v782_v44 = vpop.f32.mrf.mxu0 }
 0x1e4   : > { %v1744_v10 = vpop.f32.mrf.mxu0 }
 0x1e6   : > { %v2303_v11 = vpop.f32.mrf.mxu0 }
 0x1e8   : > { %v1745_v12 = vpop.f32.mrf.mxu0 }
 0x1ea   : > { %v2305_v51 = vpop.f32.mrf.mxu0 }
 0x1ec   : > { %v1748_v56 = vpop.f32.mrf.mxu0 }
 0x1ee   : > { %v793_v9 = vpop.f32.mrf.mxu0 }
 0x1ef   : > { %v861_v17 = vpop.f32.mrf.mxu1 }
 0x1f0   : > { %v1749_v53 = vpop.f32.mrf.mxu0 }
 0x1f1   : > { %v1754_v60 = vpop.f32.mrf.mxu1 }
 0x1f2   : > { %v951_v18 = vpop.f32.mrf.mxu0 }
 0x1f3   : > { %v864_v50 = vpop.f32.mrf.mxu1 }
 0x1f4   : > { %v865_v63 = vadd.f32 %v864_v50, %v761_v61  ;;  %v1776_v22 = vpop.f32.mrf.mxu0 }
 0x1f5   : > { %v1755_v13 = vpop.f32.mrf.mxu1 }
 0x1f6   : > { %v954_v14 = vpop.f32.mrf.mxu0 }
 0x1f7   : > { %v991_v23 = vadd.f32 %v954_v14, %v865_v63  ;;  %v869_v24 = vpop.f32.mrf.mxu1 }
 0x1f8   : > { %v870_v25 = vadd.f32 %v869_v24, %v766_v0  ;;  %v1777_v27 = vpop.f32.mrf.mxu0 }
 0x1f9   : > { %v1008_v30 = vadd.f32 %v2310_v16, %v991_v23  ;;  %v1758_v31 = vpop.f32.mrf.mxu1 }
 0x1fa   : > { %v959_v33 = vpop.f32.mrf.mxu0 }
 0x1fb   : > { %v1018_v26 = vmax.f32 %v1008_v30, 0.0  ;;  %v992_v28 = vadd.f32 %v959_v33, %v870_v25  ;;  %v872_v15 = vpop.f32.mrf.mxu1 }
 0x1fc   : > { %v873_v3 = vadd.f32 %v872_v15, %v769_v2  ;;  %v1780_v36 = vpop.f32.mrf.mxu0 }
 0x1fd   : > { %v2313_v38 = vpack.c.bf16 %v1018_v26, %v1018_v26  ;;  %v1009_v29 = vadd.f32 %v2310_v16, %v992_v28  ;;  %v1759_v39 = vpop.f32.mrf.mxu1 }
 0x1fe   : > { %v962_v32 = vpop.f32.mrf.mxu0 }
 0x1ff   : > { %v1019_v42 = vmax.f32 %v1009_v29, 0.0  ;;  %v993_v43 = vadd.f32 %v962_v32, %v873_v3  ;;  %v877_v45 = vpop.f32.mrf.mxu1  ;;  %v1116_v46 = vshrl.u32 %v2313_v38, 16  ;;  %v1119_v57 = vshll.u32 %v2313_v38, 16 }
 0x200   : > { %v878_v8 = vadd.f32 %v877_v45, %v774_v5  ;;  %v1781_v47 = vpop.f32.mrf.mxu0 }
 0x201   : > { %v2317_v19 = vpack.c.bf16 %v1019_v42, %v1019_v42  ;;  %v1010_v48 = vadd.f32 %v2310_v16, %v993_v43  ;;  %v1762_v49 = vpop.f32.mrf.mxu1  ;;  %v1118_v52 = vrot.slane %v1116_v46, 7 }
 0x202   : > { %v967_v34 = vpop.f32.mrf.mxu0 }
 0x203   : > { %v1020_v35 = vmax.f32 %v1010_v48, 0.0  ;;  %v994_v20 = vadd.f32 %v967_v34, %v878_v8  ;;  %v880_v58 = vpop.f32.mrf.mxu1  ;;  %v1123_v55 = vshrl.u32 %v2317_v19, 16  ;;  %v2326_v62 = vor.u32 %v1119_v57, %v1118_v52 }
 0x204   : > { %v881_v59 = vadd.f32 %v880_v58, %v777_v7  ;;  %v1784_v61 = vpop.f32.mrf.mxu0  ;;  %v1126_v6 = vshll.u32 %v2317_v19, 16 }
 0x205   : > { %v2328_v0 = vpack.c.bf16 %v1020_v35, %v1020_v35  ;;  %v1011_v1 = vadd.f32 %v2310_v16, %v994_v20  ;;  %v1763_v2 = vpop.f32.mrf.mxu1  ;;  %v1125_v4 = vrot.slane %v1123_v55, 7 }
 0x206   : > { %v970_v5 = vpop.f32.mrf.mxu0 }
 0x207   : > { %v1021_v40 = vmax.f32 %v1011_v1, 0.0  ;;  %v995_v10 = vadd.f32 %v970_v5, %v881_v59  ;;  %v885_v12 = vpop.f32.mrf.mxu1  ;;  %v1130_v7 = vshrl.u32 %v2328_v0, 16  ;;  %v2337_v17 = vor.u32 %v1126_v6, %v1125_v4 }
 0x208   : > { %v886_v56 = vadd.f32 %v885_v12, %v782_v44  ;;  %v1785_v9 = vpop.f32.mrf.mxu0  ;;  %v1133_v22 = vshll.u32 %v2328_v0, 16 }
 0x209   : > { %v2339_v53 = vpack.c.bf16 %v1021_v40, %v1021_v40  ;;  %v1012_v60 = vadd.f32 %v2310_v16, %v995_v10  ;;  %v1766_v18 = vpop.f32.mrf.mxu1  ;;  %v1132_v50 = vrot.slane %v1130_v7, 7 }
 0x20a   : > { %v975_v63 = vpop.f32.mrf.mxu0 }
 0x20b   : > { %v1022_v13 = vmax.f32 %v1012_v60, 0.0  ;;  %v996_v14 = vadd.f32 %v975_v63, %v886_v56  ;;  %v888_v23 = vpop.f32.mrf.mxu1  ;;  %v1137_v44 = vshrl.u32 %v2339_v53, 16  ;;  %v2349_v27 = vor.u32 %v1133_v22, %v1132_v50 }
 0x20c   : > { %v889_v24 = vadd.f32 %v888_v23, %v2303_v11  ;;  %v1788_v25 = vpop.f32.mrf.mxu0  ;;  %v1140_v15 = vshll.u32 %v2339_v53, 16 }
 0x20d   : > { %v1103_v30 = vpack.c.bf16 %v1022_v13, %v1022_v13  ;;  %v1013_v31 = vadd.f32 %v2310_v16, %v996_v14  ;;  %v1767_v33 = vpop.f32.mrf.mxu1  ;;  %v1139_v26 = vrot.slane %v1137_v44, 7 }
 0x20e   : > { %v978_v28 = vpop.f32.mrf.mxu0 }
 0x20f   : > { %v1023_v3 = vmax.f32 %v1013_v31, 0.0  ;;  %v997_v36 = vadd.f32 %v978_v28, %v889_v24  ;;  %v893_v29 = vpop.f32.mrf.mxu1  ;;  %v1144_v39 = vshrl.u32 %v1103_v30, 16  ;;  %v2356_v42 = vor.u32 %v1140_v15, %v1139_v26 }
 0x210   : > { %v894_v11 = vadd.f32 %v893_v29, %v2305_v51  ;;  %v1789_v32 = vpop.f32.mrf.mxu0  ;;  %v1147_v49 = vshll.u32 %v1103_v30, 16 }
 0x211   : > { %v1104_v43 = vpack.c.bf16 %v1023_v3, %v1023_v3  ;;  %v1014_v45 = vadd.f32 %v2310_v16, %v997_v36  ;;  %v1770_v8 = vpop.f32.mrf.mxu1  ;;  %v1146_v47 = vrot.slane %v1144_v39, 7  ;;  %v1204_v32 = vrot.slane %v1133_v22, 1 }
 0x212   : > { %v983_v48 = vpop.f32.mrf.mxu0  ;;  %v1208_v31 = vrot.slane %v1147_v49, 1 }
 0x213   : > { %v1024_v52 = vmax.f32 %v1014_v45, 0.0  ;;  %v998_v34 = vadd.f32 %v983_v48, %v894_v11  ;;  %v896_v35 = vpop.f32.mrf.mxu1  ;;  %v1151_v20 = vshrl.u32 %v1104_v43, 16  ;;  %v2359_v59 = vor.u32 %v1147_v49, %v1146_v47 }
 0x214   : > { %v1792_v58 = vpop.f32.mrf.mxu0  ;;  %v1154_v4 = vshll.u32 %v1104_v43, 16  ;;  %v1209_v3 = vor.u32 %v1208_v31, %v1144_v39  ;;  %v1205_v39 = vor.u32 %v1204_v32, %v1130_v7 }
 0x215   : > { %v1105_v61 = vpack.c.bf16 %v1024_v52, %v1024_v52  ;;  %v1015_v51 = vadd.f32 %v2310_v16, %v998_v34  ;;  %v1771_v1 = vpop.f32.mrf.mxu1  ;;  %v1153_v2 = vrot.slane %v1151_v20, 7 }
 0x216   : > { %v986_v5 = vpop.f32.mrf.mxu0  ;;  %v1210_v36 = vrot.slane %v1154_v4, 1  ;;  %v1233_v29 = vsel %vm2038_vm4, %v1209_v3, 0  ;;  %v1231_v8 = vsel %vm2038_vm4, %v1205_v39, 0 }
 0x217   : > { %v1025_v40 = vmax.f32 %v1015_v51, 0.0  ;;  %1262 = vrot.lane.b32.xlu0 %v1105_v61, %s1894_s6  ;;  %v1158_v10 = vshrl.u32 %v1105_v61, 16  ;;  %v1161_v12 = vshll.u32 %v1105_v61, 16  ;;  %v2363_v56 = vor.u32 %v1154_v4, %v1153_v2 }
 0x218   : > { %v1793_v9 = vpop.f32.mrf.mxu0  ;;  %v1211_v11 = vor.u32 %v1210_v36, %v1151_v20  ;;  %v1193_v5 = vsel %vm2184_vm7, 0, %v2359_v59 }
 0x219   : > { %v1106_v60 = vpack.c.bf16 %v1025_v40, %v1025_v40  ;;  %v1212_v18 = vrot.slane %v1161_v12, 1  ;;  %v1160_v50 = vrot.slane %v1158_v10, 7  ;;  %v1194_v40 = vsel %vm2184_vm7, 0, %v2363_v56 }
 0x21a   : > { %v1234_v45 = vsel %vm2038_vm4, %v1211_v11, 0  ;;  %v1191_v56 = vsel %vm2184_vm7, 0, %v2349_v27 }
 0x21b   : > { %1264 = vrot.lane.b32.xlu1 %v1106_v60, %s1894_s6  ;;  %v1213_v63 = vor.u32 %v1212_v18, %v1158_v10  ;;  %v1165_v13 = vshrl.u32 %v1106_v60, 16  ;;  %v1168_v16 = vshll.u32 %v1106_v60, 16  ;;  %v1163_v14 = vor.u32 %v1161_v12, %v1160_v50 }
 0x21d   : > { %v1235_v23 = vsel %vm2038_vm4, %v1213_v63, 0  ;;  %v1214_v24 = vrot.slane %v1168_v16, 1  ;;  %v1167_v25 = vrot.slane %v1165_v13, 7  ;;  %v1195_v49 = vsel %vm2184_vm7, 0, %v1163_v14 }
 0x21e   : > { %1292 = vrot.lane.b32.xlu0 %v1235_v23, %s1896_s13  ;;  %v1192_v23 = vsel %vm2184_vm7, 0, %v2356_v42  ;;  %v1189_v42 = vsel %vm2184_vm7, 0, %v2326_v62 }
 0x21f   : > { %v1215_v33 = vor.u32 %v1214_v24, %v1165_v13  ;;  %v1170_v26 = vor.u32 %v1168_v16, %v1167_v25 }
 0x221   : > { %v1236_v28 = vsel %vm2038_vm4, %v1215_v33, 0  ;;  %v1196_v54 = vsel %vm2184_vm7, 0, %v1170_v26 }
 0x222   : > { %1258 = vrot.lane.b32.xlu0 %v1103_v30, %s1894_s6  ;;  %1294 = vrot.lane.b32.xlu1 %v1236_v28, %s1896_s13  ;;  %v1206_v30 = vrot.slane %v1140_v15, 1  ;;  %v1202_v15 = vrot.slane %v1126_v6, 1 }
 0x224   : > { %v1207_v22 = vor.u32 %v1206_v30, %v1137_v44 }
 0x226   : > { %1288 = vrot.lane.b32.xlu0 %v1233_v29, %s1896_s13  ;;  %1260 = vrot.lane.b32.xlu1 %v1104_v43, %s1894_s6  ;;  %v1200_v43 = vrot.slane %v1119_v57, 1  ;;  %v1232_v7 = vsel %vm2038_vm4, %v1207_v22, 0  ;;  %v1111_v29 = vrot.slane %v1895_v21, 7 }
 0x228   : > { %v1188_v39 = vsel %vm2184_vm7, 0, %v1111_v29 }
 0x22a   : > { %1254 = vrot.lane.b32.xlu0 %v2328_v0, %s1894_s6  ;;  %1290 = vrot.lane.b32.xlu1 %v1234_v45, %s1896_s13  ;;  %v1201_v0 = vor.u32 %v1200_v43, %v1116_v46  ;;  %v1198_v46 = vrot.slane %v1895_v21, 1  ;;  %v1190_v45 = vsel %vm2184_vm7, 0, %v2337_v17 }
 0x22c   : > { %v1229_v57 = vsel %vm2038_vm4, %v1201_v0, 0  ;;  %v1228_v44 = vsel %vm2038_vm4, %v1198_v46, 0 }
 0x22e   : > { %1284 = vrot.lane.b32.xlu0 %v1231_v8, %s1896_s13  ;;  %1256 = vrot.lane.b32.xlu1 %v2339_v53, %s1894_s6  ;;  %v1203_v53 = vor.u32 %v1202_v15, %v1123_v55 }
 0x230   : > { %v1230_v6 = vsel %vm2038_vm4, %v1203_v53, 0 }
 0x232   : > { %1250 = vrot.lane.b32.xlu0 %v2313_v38, %s1894_s6  ;;  %1286 = vrot.lane.b32.xlu1 %v1232_v7, %s1896_s13  ;;  %v1897_v38 = vmov 0.0|0.0  }
 0x236   : > { %1280 = vrot.lane.b32.xlu0 %v1229_v57, %s1896_s13  ;;  %1252 = vrot.lane.b32.xlu1 %v2317_v19, %s1894_s6  ;;  %v1541_v19 = vld [vmem:[%s2524_s4] sm:$0xff] }
 0x23a   : > { %1282 = vrot.lane.b32.xlu1 %v1230_v6, %s1896_s13  ;;  %1266 = vrot.lane.b32.xlu0 %v1897_v38, %s1894_s6  ;;  %v1678_v6 = vld [vmem:[%s2523_s3 + $0x4] sm:$0xf] }
 0x23e   : > { %1296 = vrot.lane.b32.xlu1 %v1228_v44, %s1896_s13  ;;  %1248 = vrot.lane.b32.xlu0 %v1897_v38, %s1894_s6 }
 0x242   : > { %1278 = vrot.lane.b32.xlu1 %v1228_v44, %s1896_s13  ;;  %1544 = vperm.xlu0 %1862, %v1541_v19  }
 0x289   : > { %v1263_v55 = vpop.permute.xlu0 %1262 }
 0x28a   : > { %v1321_v52 = vsel %vm644_vm9, %v1195_v49, %v1263_v55 }
 0x28d   : > { %v1265_v47 = vpop.permute.xlu1 %1264 }
 0x28e   : > { %v1324_v34 = vsel %vm644_vm9, %v1196_v54, %v1265_v47 }
 0x290   : > { %v1293_v48 = vpop.permute.xlu0 %1292 }
 0x291   : > { %v2431_v58 = vsel %vm1328_vm11, %v1321_v52, %v1293_v48 }
 0x294   : > { %v1295_v35 = vpop.permute.xlu1 %1294  ;;  %v1259_v20 = vpop.permute.xlu0 %1258 }
 0x295   : > { %v1346_v61 = vsel %vm1328_vm11, %v1324_v34, %v1295_v35  ;;  %v1315_v10 = vsel %vm644_vm9, %v1193_v5, %v1259_v20  ;;  %v1689_v34 = vld [vmem:[%s2523_s3 + $0x8] sm:$0xf]  ;;  %v1349_v35 = vld [vmem:[%s2523_s3] sm:$0xf] }
 0x296   : > { %v1682_v51 = vcombine.low %v2431_v58, %v1346_v61 }
 0x298   : > { %v1261_v1 = vpop.permute.xlu1 %1260  ;;  %v1289_v2 = vpop.permute.xlu0 %1288  ;;  %v1386_v4 = vsel %vm1372_vm12, %v1682_v51, 0 }
 0x299   : > { %1795 = vmatpush3.bf16.xpose.msra.mxu1 %v1386_v4  ;;  %v1318_v12 = vsel %vm644_vm9, %v1194_v40, %v1261_v1  ;;  %v1340_v18 = vsel %vm1328_vm11, %v1315_v10, %v1289_v2 }
 0x29a   : > { %1796 = vmatprep.subr.bf16.mxu1 %v1891_v37 }
 0x29c   : > { %v1291_v9 = vpop.permute.xlu1 %1290  ;;  %v1255_v60 = vpop.permute.xlu0 %1254 }
 0x29d   : > { %v1342_v50 = vsel %vm1328_vm11, %v1318_v12, %v1291_v9  ;;  %v1309_v24 = vsel %vm644_vm9, %v1191_v56, %v1255_v60 }
 0x29e   : > { %v1681_v63 = vcombine.low %v1340_v18, %v1342_v50  ;;  %v1687_v13 = vcombine.low %v1342_v50, %v2431_v58 }
 0x2a0   : > { %v1257_v16 = vpop.permute.xlu1 %1256  ;;  %v1285_v14 = vpop.permute.xlu0 %1284  ;;  %v1383_v59 = vsel %vm1372_vm12, %v1681_v63, 0  ;;  %v1447_v38 = vsel %vm1372_vm12, %v1687_v13, 0 }
 0x2a1   : > { %1797 = vmatpush3.bf16.xpose.msra.mxu1 %v1383_v59  ;;  %v1312_v25 = vsel %vm644_vm9, %v1192_v23, %v1257_v16  ;;  %v1336_v26 = vsel %vm1328_vm11, %v1309_v24, %v1285_v14 }
 0x2a2   : > { %1798 = vmatprep.subr.bf16.mxu1 %v1891_v37 }
 0x2a4   : > { %v1287_v31 = vpop.permute.xlu1 %1286  ;;  %v1251_v33 = vpop.permute.xlu0 %1250 }
 0x2a5   : > { %v1338_v28 = vsel %vm1328_vm11, %v1312_v25, %v1287_v31  ;;  %v1303_v21 = vsel %vm644_vm9, %v1189_v42, %v1251_v33 }
 0x2a6   : > { %v1680_v3 = vcombine.low %v1336_v26, %v1338_v28  ;;  %v1686_v36 = vcombine.low %v1338_v28, %v1340_v18 }
 0x2a8   : > { %v1253_v11 = vpop.permute.xlu1 %1252  ;;  %v1281_v27 = vpop.permute.xlu0 %1280  ;;  %v1380_v32 = vsel %vm1372_vm12, %v1680_v3, 0  ;;  %v1444_v44 = vsel %vm1372_vm12, %v1686_v36, 0 }
 0x2a9   : > { %1799 = vmatpush3.bf16.xpose.msra.mxu1 %v1380_v32  ;;  %v1306_v30 = vsel %vm644_vm9, %v1190_v45, %v1253_v11  ;;  %v1332_v43 = vsel %vm1328_vm11, %v1303_v21, %v1281_v27 }
 0x2aa   : > { %1800 = vmatprep.subr.bf16.mxu1 %v1891_v37 }
 0x2ac   : > { %v1283_v8 = vpop.permute.xlu1 %1282  ;;  %v1267_v22 = vpop.permute.xlu0 %1266 }
 0x2ad   : > { %v1334_v7 = vsel %vm1328_vm11, %v1306_v30, %v1283_v8  ;;  %v1327_v62 = vsel %vm644_vm9, %v1188_v39, %v1267_v22 }
 0x2ae   : > { %v1679_v0 = vcombine.low %v1332_v43, %v1334_v7  ;;  %v1685_v15 = vcombine.low %v1334_v7, %v1336_v26 }
 0x2b0   : > { %v1297_v57 = vpop.permute.xlu1 %1296  ;;  %v1377_v17 = vsel %vm1372_vm12, %v1679_v0, 0  ;;  %v1249_v19 = vpop.permute.xlu0 %1248  ;;  %v1441_v48 = vsel %vm1372_vm12, %v1685_v15, 0 }
 0x2b1   : > { %v1348_v41 = vsel %vm1328_vm11, %v1327_v62, %v1297_v57  ;;  %1801 = vmatpush3.bf16.xpose.msra.mxu1 %v1377_v17  ;;  %v1300_v55 = vsel %vm644_vm9, %v1188_v39, %v1249_v19 }
 0x2b2   : > { %v1690_v53 = vcombine.low %v1346_v61, %v1348_v41  ;;  %1806 = vmatprep.subr.bf16.mxu1 %v1891_v37 }
 0x2b4   : > { %v1498_v46 = vsel %vm1372_vm12, %v1690_v53, 0  ;;  %v1279_v47 = vpop.permute.xlu1 %1278 }
 0x2b5   : > { %1819 = vmatpush3.bf16.xpose.msra.mxu0 %v1498_v46  ;;  %v1330_v49 = vsel %vm1328_vm11, %v1300_v55, %v1279_v47 }
 0x2b6   : > { %1820 = vmatprep.subr.bf16.mxu0 %v1891_v37  ;;  %v1684_v54 = vcombine.low %v1330_v49, %v1332_v43 }
 0x2b8   : > { %1803 = vmatmul.mubr.msk.bf16.vlgmr.msra.gmra.mxu1 %vm1372_vm12, %v1678_v6  ;;  %v1438_v52 = vsel %vm1372_vm12, %v1684_v54, 0 }
 0x2b9   : > { %1807 = vmatpush3.bf16.xpose.msra.mxu1 %v1447_v38  ;;  %1814 = vmatprep.mubr.msk.bf16.mxu1 %vm1893_vm3, %v1891_v37 }
 0x2ba   : > { %1808 = vmatprep.subr.bf16.mxu1 %v1891_v37 }
 0x2bd   : > { %1821 = vmatpush3.bf16.xpose.msra.mxu0 %v1447_v38  ;;  %v1545_v40 = vpop.permute.xlu0 %1544 }
 0x2be   : > { %1822 = vmatprep.subr.bf16.mxu0 %v1891_v37 }
 0x2c1   : > { %1809 = vmatpush3.bf16.xpose.msra.mxu1 %v1444_v44 }
 0x2c2   : > { %1810 = vmatprep.subr.bf16.mxu1 %v1891_v37 }
 0x2c5   : > { %1823 = vmatpush3.bf16.xpose.msra.mxu0 %v1444_v44 }
 0x2c6   : > { %1824 = vmatprep.subr.bf16.mxu0 %v1891_v37 }
 0x2c9   : > { %1811 = vmatpush3.bf16.xpose.msra.mxu1 %v1441_v48 }
 0x2ca   : > { %1812 = vmatprep.subr.bf16.mxu1 %v1891_v37 }
 0x2cd   : > { %1825 = vmatpush3.bf16.xpose.msra.mxu0 %v1441_v48 }
 0x2d1   : > { %1813 = vmatpush3.bf16.xpose.msra.mxu1 %v1438_v52 }
 0x2d4   : > { %1827 = vmatmul.mubr.msk.bf16.vlgmr.msra.gmra.mxu0 %vm1372_vm12, %v1689_v34 }
 0x2d8   : > { %1815 = vmatmul.mubr.msk.bf16.vlgmr.msra.gmra.mxu1 %vm1372_vm12, %v1349_v35 }
 0x378   : > { %v1422_v20 = vpop.f32.mrf.mxu1 }
 0x37a   : > { %v1804_v37 = vpop.f32.mrf.mxu1 }
 0x37c   : > { %v1425_v58 = vpop.f32.mrf.mxu1 }
 0x37e   : > { %v1805_v61 = vpop.f32.mrf.mxu1 }
 0x394   : > { %v1534_v51 = vpop.f32.mrf.mxu0 }
 0x396   : > { %v1828_v1 = vpop.f32.mrf.mxu0 }
 0x398   : > { %v1483_v2 = vpop.f32.mrf.mxu1  ;;  %v1537_v4 = vpop.f32.mrf.mxu0 }
 0x399   : > { %v1484_v5 = vadd.f32 %v1483_v2, %v1422_v20 }
 0x39a   : > { %v1816_v10 = vpop.f32.mrf.mxu1  ;;  %v1829_v12 = vpop.f32.mrf.mxu0 }
 0x39b   : > { %v1540_v9 = vadd.f32 %v1534_v51, %v1484_v5 }
 0x39c   : > { %v1486_v60 = vpop.f32.mrf.mxu1 }
 0x39d   : > { %v1547_v18 = vadd.f32 %v1545_v40, %v1540_v9 }
 0x39e   : > { %v1817_v50 = vpop.f32.mrf.mxu1 }
 0x39f   : > { %v1548_v63 = vmax.f32 %v1547_v18, 0.0 }
 0x3a1   : > { %1550 = vst.msk [vmem:[%s247_s29] sm:$0xff] %vm1549_vm13, %v1548_v63 }
 0x3a2 PF: > { %s15_s20 = sadd.s32 1, %s1888_s20   ;;  %s2530_s18 = smov %s1884_s19 }
 0x3a3   : > { %p12_p6 = scmp.ge.s32.totalorder %s15_s20, 4   ;;  %s2531_s19 = smov %s2533_s21 }
 0x3a5   :  { %14 = sbr.rel (!%p12_p6) target bundleno = 2 (0x2), region = 75 }

</bundles_post_ra>
